<compile_context>
chip_gen: v5e
topology: v5e:2x2
jax: 0.10.0
libtpu: 0.0.40
codegen_flags: <defaults>
</compile_context>

<pallas_src>
import functools

import numpy as np
import jax
import jax.numpy as jnp
from jax import lax
from jax.experimental import pallas as pl
from jax.experimental.pallas import tpu as pltpu


# ------------------------------ tiling helpers --------------------------------
def _divisor_tile(total, target, align):
    """Largest divisor of `total` that is <= target and a multiple of `align`
    (or equal to `total`, which is always a legal Pallas block extent)."""
    best = None
    for d in range(1, min(total, target) + 1):
        if total % d == 0 and (d % align == 0 or d == total):
            best = d
    return best if best is not None else total


def _pick_num_bands(Ho, W, Cin, kh, kw, elem_bytes, target_bytes=2 << 20):
    """Output-row bands per image for the conv kernel.

    Prefers >=2 bands (second 'parallel' axis for v7x megacore) with the
    largest band whose im2col working set (kh*kw*Cin x band_len) fits
    `target_bytes`, subject to the lane-dense store constraint
    (band_len % 128 == 0 unless there is a single band)."""
    valid = []
    for nb in range(1, Ho + 1):
        if Ho % nb:
            continue
        hb = Ho // nb
        if nb > 1 and (hb * W) % 128 != 0:
            continue
        valid.append(nb)

    def cols_bytes(nb):
        return kh * kw * Cin * (Ho // nb) * W * elem_bytes

    for nb in valid:
        if nb >= 2 and cols_bytes(nb) <= target_bytes:
            return nb
    for nb in valid:
        if cols_bytes(nb) <= target_bytes:
            return nb
    return valid[-1]


# ---------------------------------- kernels ------------------------------------
def _conv_stats_kernel(x_ref, w_ref, m_ref, y_ref, stats_ref, *,
                       W, kh, kw, pw, band_len):
    """One (image, output-row band): k x k conv as a single im2col matmul,
    plus per-band BatchNorm statistics (mean, centered M2).

    x_ref    : (1, 1, Cin, win_len)  lane-dense band window (flattened spatial).
    w_ref    : (Cout, kh*kw*Cin)     weights, tap-major / cin-minor.
    m_ref    : (kw, band_len)        0/1 column-validity masks (one per kx).
    y_ref    : (1, Cout, band_len)   conv output (NCHW-flat in HBM).
    stats_ref: (1, 1, Cout, 2)       per-band (mean, centered M2).
    """
    xw = x_ref[0, 0]                       # (Cin, win_len), compute dtype
    masks = m_ref[...]                     # (kw, band_len)

    # im2col: each tap is a static lane slice (+ column mask) of the
    # lane-dense window -- no XLU relayout.  Tap order matches w_ref.
    taps = []
    for ky in range(kh):
        for kx in range(kw):
            off = ky * W + kx
            slab = xw[:, off:off + band_len]            # (Cin, band_len)
            if kx != pw:                                # center column needs no mask
                slab = slab * masks[kx:kx + 1, :]
            taps.append(slab)
    cols_t = jnp.concatenate(taps, axis=0)              # (kh*kw*Cin, band_len)

    # Single MXU call; result is lane-dense (Cout, band_len), f32 accumulation.
    y = jnp.dot(w_ref[...], cols_t, preferred_element_type=jnp.float32)

    # Per-band BN statistics: band mean + centered sum of squares (combined
    # across bands in the wrapper; avoids E[y^2]-E[y]^2 cancellation).
    bmean = jnp.sum(y, axis=1, keepdims=True) * (1.0 / band_len)   # (Cout, 1)
    d = y - bmean
    bm2 = jnp.sum(d * d, axis=1, keepdims=True)                    # (Cout, 1)
    stats_ref[0, 0] = jnp.concatenate([bmean, bm2], axis=1)        # (Cout, 2)

    y_ref[0] = y.astype(y_ref.dtype)


def _bn_prelu_apply_kernel(y_ref, scale_ref, shift_ref, alpha_ref, o_ref):
    """Elementwise y*scale + shift followed by PReLU on (rows, cols) blocks.
    Rows are (batch*channel), so scale/shift/alpha are per-row (rows, 1)."""
    z = y_ref[...].astype(jnp.float32) * scale_ref[...] + shift_ref[...]
    o_ref[...] = jnp.where(z >= 0.0, z, alpha_ref[...] * z).astype(o_ref.dtype)


# ---------------------------------- forward ------------------------------------
def cbr_forward(x_nchw, weight_oihw, gamma, beta, alpha, *,
                stride=1, eps=1e-3, mxu_dtype=jnp.bfloat16):
    """CBR forward. x_nchw: (N, Cin, H, W) f32 -> (N, Cout, Ho, Wo) f32.

    mxu_dtype: dtype of the matmul operands (bf16 = native MXU path on
    v6e/v7x; f32 = exact-parity mode).  Accumulation is always f32.
    """
    N, Cin, H, W = x_nchw.shape
    Cout, _, kh, kw = weight_oihw.shape
    ph, pw = (kh - 1) // 2, (kw - 1) // 2
    Ho = (H + 2 * ph - kh) // stride + 1
    Wo = (W + 2 * pw - kw) // stride + 1

    if stride != 1 or kh % 2 == 0 or kw % 2 == 0:
        # TODO(synk): add a strided / even-kSize path (CGNet's CBR is used
        # with stride=1 and odd kSize; downsampling uses a different block).
        raise NotImplementedError("Pallas CBR fast path needs stride=1, odd kSize.")
    assert Ho == H and Wo == W

    elem = jnp.dtype(mxu_dtype).itemsize
    n_bands = _pick_num_bands(Ho, W, Cin, kh, kw, elem)
    hb = Ho // n_bands
    band_len = hb * W
    win_len = band_len + (kh - 1) * W + 2 * pw
    kk = kh * kw * Cin

    # ---- wrapper-side layout plumbing (all cheap XLA ops in HBM) ----
    # Zero-pad rows only; flatten spatial onto the lane axis; pad pw lanes at
    # each end so every tap's lane slice stays in bounds.  Column padding is
    # applied in-kernel via the 0/1 masks instead of materialized zeros.
    x_rp = jnp.pad(x_nchw, ((0, 0), (0, 0), (ph, ph), (0, 0)))
    x_lane = x_rp.reshape(N, Cin, (H + 2 * ph) * W)
    x_lane = jnp.pad(x_lane, ((0, 0), (0, 0), (pw, pw)))
    # Halo'd per-band windows so the conv grid needs no overlapping BlockSpecs.
    xb = jnp.stack(
        [lax.slice_in_dim(x_lane, r * band_len, r * band_len + win_len, axis=2)
         for r in range(n_bands)], axis=1).astype(mxu_dtype)   # (N, nb, Cin, win_len)

    # OIHW -> (Cout, kh*kw*Cin), tap-major / cin-minor (matches the kernel).
    w2 = jnp.transpose(weight_oihw, (0, 2, 3, 1)).reshape(Cout, kk).astype(mxu_dtype)

    # Column-validity masks (one per kx tap offset), identical for every band.
    wo_idx = np.arange(band_len) % W
    colmask = np.stack(
        [((wo_idx + kx - pw >= 0) & (wo_idx + kx - pw < W)).astype(np.float32)
         for kx in range(kw)], axis=0)
    colmask = jnp.asarray(colmask, dtype=mxu_dtype)            # (kw, band_len)

    conv_kernel = functools.partial(_conv_stats_kernel, W=W, kh=kh, kw=kw,
                                    pw=pw, band_len=band_len)

    y_flat, stats = pl.pallas_call(
        conv_kernel,
        out_shape=(jax.ShapeDtypeStruct((N, Cout, Ho * Wo), jnp.float32),
                   jax.ShapeDtypeStruct((N, n_bands, Cout, 2), jnp.float32)),
        grid_spec=pltpu.PrefetchScalarGridSpec(
            num_scalar_prefetch=0,
            grid=(N, n_bands),
            in_specs=[
                pl.BlockSpec((1, 1, Cin, win_len), lambda b, r: (b, r, 0, 0)),
                pl.BlockSpec((Cout, kk), lambda b, r: (0, 0)),
                pl.BlockSpec((kw, band_len), lambda b, r: (0, 0)),
            ],
            out_specs=[
                pl.BlockSpec((1, Cout, band_len), lambda b, r: (b, 0, r)),
                pl.BlockSpec((1, 1, Cout, 2), lambda b, r: (b, r, 0, 0)),
            ],
        ),
        compiler_params=pltpu.CompilerParams(
            dimension_semantics=("parallel", "parallel"),
            vmem_limit_bytes=32 * 1024 * 1024),
    )(xb, w2, colmask)

    # ---- tiny cross-band/batch stats combination + BN folding (wrapper) ----
    bmean, bm2 = stats[..., 0], stats[..., 1]                  # (N, nb, Cout)
    mean = jnp.mean(bmean, axis=(0, 1))                        # equal band sizes
    m2 = (jnp.sum(bm2, axis=(0, 1))
          + band_len * jnp.sum(jnp.square(bmean - mean), axis=(0, 1)))
    var = m2 / float(N * Ho * Wo)                              # biased (train-mode BN)
    scale = gamma.astype(jnp.float32) * lax.rsqrt(var + eps)
    shift = beta.astype(jnp.float32) - mean * scale

    # ---- BN + PReLU apply: big lane-dense blocks over (N*Cout, Ho*Wo) ----
    rows, lanes = N * Cout, Ho * Wo
    r_tile = _divisor_tile(rows, 256, 8)
    c_tile = _divisor_tile(lanes, 2048, 128)
    scale_r = jnp.tile(scale, N).reshape(rows, 1)
    shift_r = jnp.tile(shift, N).reshape(rows, 1)
    alpha_r = jnp.tile(alpha.astype(jnp.float32), N).reshape(rows, 1)

    out_flat = pl.pallas_call(
        _bn_prelu_apply_kernel,
        out_shape=jax.ShapeDtypeStruct((rows, lanes), jnp.float32),
        grid_spec=pltpu.PrefetchScalarGridSpec(
            num_scalar_prefetch=0,
            grid=(rows // r_tile, lanes // c_tile),
            in_specs=[
                pl.BlockSpec((r_tile, c_tile), lambda i, j: (i, j)),
                pl.BlockSpec((r_tile, 1), lambda i, j: (i, 0)),
                pl.BlockSpec((r_tile, 1), lambda i, j: (i, 0)),
                pl.BlockSpec((r_tile, 1), lambda i, j: (i, 0)),
            ],
            out_specs=pl.BlockSpec((r_tile, c_tile), lambda i, j: (i, j)),
        ),
        compiler_params=pltpu.CompilerParams(
            dimension_semantics=("parallel", "parallel"),
            vmem_limit_bytes=32 * 1024 * 1024),
    )(y_flat.reshape(rows, lanes), scale_r, shift_r, alpha_r)

    return out_flat.reshape(N, Cout, Ho, Wo)                   # already NCHW


# ------------------------------ pure-JAX reference ------------------------------
def _reference(x_nchw, weight_oihw, gamma, beta, alpha, *, stride=1, eps=1e-3):
    kh, kw = weight_oihw.shape[2], weight_oihw.shape[3]
    ph, pw = (kh - 1) // 2, (kw - 1) // 2
    y = lax.conv_general_dilated(
        x_nchw, weight_oihw, window_strides=(stride, stride),
        padding=[(ph, ph), (pw, pw)],
        dimension_numbers=("NCHW", "OIHW", "NCHW"))
    mean = jnp.mean(y, axis=(0, 2, 3), keepdims=True)
    var = jnp.mean(jnp.square(y - mean), axis=(0, 2, 3), keepdims=True)
    z = (y - mean) * lax.rsqrt(var + eps)
    z = z * gamma.reshape(1, -1, 1, 1) + beta.reshape(1, -1, 1, 1)
    return jnp.where(z >= 0, z, alpha.reshape(1, -1, 1, 1) * z)


if __name__ == "__main__":
    key = jax.random.PRNGKey(0)
    N, Cin, H, W = 2, 4, 16, 16
    Cout, kSize, stride = 32, 3, 1

    ks = jax.random.split(key, 5)
    x = jax.random.normal(ks[0], (N, Cin, H, W), jnp.float32)
    weight = 0.3 * jax.random.normal(ks[1], (Cout, Cin, kSize, kSize), jnp.float32)
    gamma = 1.0 + 0.1 * jax.random.normal(ks[2], (Cout,), jnp.float32)
    beta = 0.1 * jax.random.normal(ks[3], (Cout,), jnp.float32)
    alpha = jnp.full((Cout,), 0.25, jnp.float32)   # nn.PReLU default init

    ref = _reference(x, weight, gamma, beta, alpha, stride=stride)

    # Production path: bf16 MXU operands (native on v6e/v7x), f32 accumulation.
    out_bf16 = jax.block_until_ready(
        cbr_forward(x, weight, gamma, beta, alpha, stride=stride,
                    mxu_dtype=jnp.bfloat16))
    np.testing.assert_allclose(np.asarray(out_bf16), np.asarray(ref),
                               rtol=2e-2, atol=2e-2)   # bf16-operand tolerance

    # Exact-parity path: f32 operands, tight tolerance vs. the f32 reference.
    out_f32 = jax.block_until_ready(
        cbr_forward(x, weight, gamma, beta, alpha, stride=stride,
                    mxu_dtype=jnp.float32))
    np.testing.assert_allclose(np.asarray(out_f32), np.asarray(ref),
                               rtol=1e-3, atol=1e-3)

    print("KERNEL_OK")
</pallas_src>

<mosaic_0001>
module attributes {stable_mosaic.version = 11 : i64} {
  func.func @_conv_stats_kernel(%arg0: i32, %arg1: i32, %arg2: memref<1x1x4x162xbf16, #tpu.memory_space<vmem>>, %arg3: memref<32x36xbf16, #tpu.memory_space<vmem>>, %arg4: memref<3x128xbf16, #tpu.memory_space<vmem>>, %arg5: memref<1x32x128xf32, #tpu.memory_space<vmem>>, %arg6: memref<1x1x32x2xf32, #tpu.memory_space<vmem>>) attributes {dimension_semantics = [#tpu.dimension_semantics<parallel>, #tpu.dimension_semantics<parallel>], iteration_bounds = array<i64: 2, 2>, scalar_prefetch = 0 : i64, scratch_operands = 0 : i64, tpu.core_type = #tpu.core_type<tc>, window_params = [{transform_indices = @transform_0, window_bounds = array<i64: 1, 1, 4, 162>}, {pipeline_mode = #tpu.pipeline_mode<synchronous>, transform_indices = @transform_1, window_bounds = array<i64: 32, 36>}, {pipeline_mode = #tpu.pipeline_mode<synchronous>, transform_indices = @transform_2, window_bounds = array<i64: 3, 128>}, {transform_indices = @transform_3, window_bounds = array<i64: 1, 32, 128>}, {transform_indices = @transform_4, window_bounds = array<i64: 1, 1, 32, 2>}]} {
    %c0 = arith.constant 0 : index
    %c0_0 = arith.constant 0 : index
    %c0_1 = arith.constant 0 : index
    %c0_2 = arith.constant 0 : index
    %0 = vector.load %arg2[%c0, %c0_0, %c0_1, %c0_2] : memref<1x1x4x162xbf16, #tpu.memory_space<vmem>>, vector<1x1x4x162xbf16>
    %1 = vector.shape_cast %0 : vector<1x1x4x162xbf16> to vector<4x162xbf16>
    %c0_3 = arith.constant 0 : index
    %c0_4 = arith.constant 0 : index
    %2 = vector.load %arg4[%c0_3, %c0_4] : memref<3x128xbf16, #tpu.memory_space<vmem>>, vector<3x128xbf16>
    %3 = vector.extract_strided_slice %1 {offsets = [0, 0], sizes = [4, 128], strides = [1, 1]} : vector<4x162xbf16> to vector<4x128xbf16>
    %4 = vector.extract_strided_slice %2 {offsets = [0, 0], sizes = [1, 128], strides = [1, 1]} : vector<3x128xbf16> to vector<1x128xbf16>
    %5 = vector.broadcast %4 : vector<1x128xbf16> to vector<4x128xbf16>
    %6 = arith.mulf %3, %5 : vector<4x128xbf16>
    %7 = vector.extract_strided_slice %1 {offsets = [0, 1], sizes = [4, 128], strides = [1, 1]} : vector<4x162xbf16> to vector<4x128xbf16>
    %8 = vector.extract_strided_slice %1 {offsets = [0, 2], sizes = [4, 128], strides = [1, 1]} : vector<4x162xbf16> to vector<4x128xbf16>
    %9 = vector.extract_strided_slice %2 {offsets = [2, 0], sizes = [1, 128], strides = [1, 1]} : vector<3x128xbf16> to vector<1x128xbf16>
    %10 = vector.broadcast %9 : vector<1x128xbf16> to vector<4x128xbf16>
    %11 = arith.mulf %8, %10 : vector<4x128xbf16>
    %12 = vector.extract_strided_slice %1 {offsets = [0, 16], sizes = [4, 128], strides = [1, 1]} : vector<4x162xbf16> to vector<4x128xbf16>
    %13 = vector.extract_strided_slice %2 {offsets = [0, 0], sizes = [1, 128], strides = [1, 1]} : vector<3x128xbf16> to vector<1x128xbf16>
    %14 = vector.broadcast %13 : vector<1x128xbf16> to vector<4x128xbf16>
    %15 = arith.mulf %12, %14 : vector<4x128xbf16>
    %16 = vector.extract_strided_slice %1 {offsets = [0, 17], sizes = [4, 128], strides = [1, 1]} : vector<4x162xbf16> to vector<4x128xbf16>
    %17 = vector.extract_strided_slice %1 {offsets = [0, 18], sizes = [4, 128], strides = [1, 1]} : vector<4x162xbf16> to vector<4x128xbf16>
    %18 = vector.extract_strided_slice %2 {offsets = [2, 0], sizes = [1, 128], strides = [1, 1]} : vector<3x128xbf16> to vector<1x128xbf16>
    %19 = vector.broadcast %18 : vector<1x128xbf16> to vector<4x128xbf16>
    %20 = arith.mulf %17, %19 : vector<4x128xbf16>
    %21 = vector.extract_strided_slice %1 {offsets = [0, 32], sizes = [4, 128], strides = [1, 1]} : vector<4x162xbf16> to vector<4x128xbf16>
    %22 = vector.extract_strided_slice %2 {offsets = [0, 0], sizes = [1, 128], strides = [1, 1]} : vector<3x128xbf16> to vector<1x128xbf16>
    %23 = vector.broadcast %22 : vector<1x128xbf16> to vector<4x128xbf16>
    %24 = arith.mulf %21, %23 : vector<4x128xbf16>
    %25 = vector.extract_strided_slice %1 {offsets = [0, 33], sizes = [4, 128], strides = [1, 1]} : vector<4x162xbf16> to vector<4x128xbf16>
    %26 = vector.extract_strided_slice %1 {offsets = [0, 34], sizes = [4, 128], strides = [1, 1]} : vector<4x162xbf16> to vector<4x128xbf16>
    %27 = vector.extract_strided_slice %2 {offsets = [2, 0], sizes = [1, 128], strides = [1, 1]} : vector<3x128xbf16> to vector<1x128xbf16>
    %28 = vector.broadcast %27 : vector<1x128xbf16> to vector<4x128xbf16>
    %29 = arith.mulf %26, %28 : vector<4x128xbf16>
    %30 = tpu.concatenate %6, %7, %11, %15, %16, %20, %24, %25, %29 in 0 : vector<4x128xbf16>, vector<4x128xbf16>, vector<4x128xbf16>, vector<4x128xbf16>, vector<4x128xbf16>, vector<4x128xbf16>, vector<4x128xbf16>, vector<4x128xbf16>, vector<4x128xbf16> -> vector<36x128xbf16>
    %c0_5 = arith.constant 0 : index
    %c0_6 = arith.constant 0 : index
    %31 = vector.load %arg3[%c0_5, %c0_6] : memref<32x36xbf16, #tpu.memory_space<vmem>>, vector<32x36xbf16>
    %cst = arith.constant dense<0.000000e+00> : vector<32x128xf32>
    %32 = tpu.matmul %31, %30, %cst {dimension_numbers = #tpu.dot_dimension_numbers<[1], [0], [0], [1], [0, 0, 1, 1], [], []>} : vector<32x36xbf16>, vector<36x128xbf16>, vector<32x128xf32> -> vector<32x128xf32>
    %cst_7 = arith.constant dense<0.000000e+00> : vector<32xf32>
    %33 = vector.multi_reduction <add>, %32, %cst_7 [1] : vector<32x128xf32> to vector<32xf32>
    %34 = vector.shape_cast %33 : vector<32xf32> to vector<32x1xf32>
    %cst_8 = arith.constant 7.812500e-03 : f32
    %35 = vector.broadcast %cst_8 : f32 to vector<32x1xf32>
    %36 = arith.mulf %34, %35 : vector<32x1xf32>
    %37 = vector.broadcast %36 : vector<32x1xf32> to vector<32x128xf32>
    %38 = arith.subf %32, %37 : vector<32x128xf32>
    %39 = arith.mulf %38, %38 : vector<32x128xf32>
    %cst_9 = arith.constant dense<0.000000e+00> : vector<32xf32>
    %40 = vector.multi_reduction <add>, %39, %cst_9 [1] : vector<32x128xf32> to vector<32xf32>
    %41 = vector.shape_cast %40 : vector<32xf32> to vector<32x1xf32>
    %42 = tpu.concatenate %36, %41 in 1 : vector<32x1xf32>, vector<32x1xf32> -> vector<32x2xf32>
    %c0_10 = arith.constant 0 : index
    %c0_11 = arith.constant 0 : index
    %c0_12 = arith.constant 0 : index
    %c0_13 = arith.constant 0 : index
    %43 = vector.load %arg6[%c0_10, %c0_11, %c0_12, %c0_13] : memref<1x1x32x2xf32, #tpu.memory_space<vmem>>, vector<1x1x32x2xf32>
    %44 = vector.shape_cast %43 : vector<1x1x32x2xf32> to vector<32x2xf32>
    %45 = vector.shape_cast %42 : vector<32x2xf32> to vector<1x1x32x2xf32>
    tpu.vector_store %arg6[%c0_10, %c0_11, %c0_12, %c0_13], %45 {strides = array<i32>} : memref<1x1x32x2xf32, #tpu.memory_space<vmem>>, vector<1x1x32x2xf32>,
    %c0_14 = arith.constant 0 : index
    %c0_15 = arith.constant 0 : index
    %c0_16 = arith.constant 0 : index
    %46 = vector.load %arg5[%c0_14, %c0_15, %c0_16] : memref<1x32x128xf32, #tpu.memory_space<vmem>>, vector<1x32x128xf32>
    %47 = vector.shape_cast %46 : vector<1x32x128xf32> to vector<32x128xf32>
    %48 = vector.shape_cast %32 : vector<32x128xf32> to vector<1x32x128xf32>
    tpu.vector_store %arg5[%c0_14, %c0_15, %c0_16], %48 {strides = array<i32>} : memref<1x32x128xf32, #tpu.memory_space<vmem>>, vector<1x32x128xf32>,
    return
  }
  func.func @transform_0(%arg0: i32, %arg1: i32) -> (i32, i32, i32, i32) {
    %c0_i32 = arith.constant 0 : i32
    %c0_i32_0 = arith.constant 0 : i32
    %c0_i32_1 = arith.constant 0 : i32
    return %arg0, %arg1, %c0_i32, %c0_i32_0 : i32, i32, i32, i32
  }
  func.func @transform_1(%arg0: i32, %arg1: i32) -> (i32, i32) {
    %c0_i32 = arith.constant 0 : i32
    %c0_i32_0 = arith.constant 0 : i32
    %c0_i32_1 = arith.constant 0 : i32
    return %c0_i32, %c0_i32_0 : i32, i32
  }
  func.func @transform_2(%arg0: i32, %arg1: i32) -> (i32, i32) {
    %c0_i32 = arith.constant 0 : i32
    %c0_i32_0 = arith.constant 0 : i32
    %c0_i32_1 = arith.constant 0 : i32
    return %c0_i32, %c0_i32_0 : i32, i32
  }
  func.func @transform_3(%arg0: i32, %arg1: i32) -> (i32, i32, i32) {
    %c0_i32 = arith.constant 0 : i32
    %c0_i32_0 = arith.constant 0 : i32
    return %arg0, %c0_i32, %arg1 : i32, i32, i32
  }
  func.func @transform_4(%arg0: i32, %arg1: i32) -> (i32, i32, i32, i32) {
    %c0_i32 = arith.constant 0 : i32
    %c0_i32_0 = arith.constant 0 : i32
    %c0_i32_1 = arith.constant 0 : i32
    return %arg0, %arg1, %c0_i32, %c0_i32_0 : i32, i32, i32, i32
  }
}

</mosaic_0001>

<bundles_post_ra>
// kernel: tpu_custom_call.1
= control target key start
LH: loop header
LB: loop body
LE: loop exit
PB: predicated region body
PF: predicated region fallthrough
CT: control target
= control target key end

     0   :  { %s1365_s0 = inlined_call_operand.hbm [shape: bf16[2,2,4,162], index: 0, kind: input, shape index: {}]   ;;  %s1366_s1 = inlined_call_operand.hbm [shape: bf16[32,36], index: 1, kind: input, shape index: {}]   ;;  %s1367_s2 = inlined_call_operand.hbm [shape: bf16[3,128], index: 2, kind: input, shape index: {}]   ;;  %s1368_s3 = inlined_call_operand.hbm [shape: f32[2,32,256], index: 3, kind: output, shape index: {0}]   ;;  %s1369_s4 = inlined_call_operand.vmem [shape: f32[2,2,32,2], index: 4, kind: output, shape index: {1}]  }
   0x1   :  { %1373 = sst [smem:[#allocation15_spill]] %s1366_s1 }
   0x2   :  { %1374 = sst [smem:[#allocation16_spill]] %s1367_s2 }
   0x3   :  { %10 = vsyncpa [#allocation3], 0 }
   0x4   :  { %12 = vsyncpa [#allocation3 + $0x1], 0 }
   0x5   :  { %13 = vsyncpa [#allocation6], 0 }
   0x6   :  { %14 = vsyncpa [#allocation4], 0 }
   0x7   :  { %16 = vsyncpa [#allocation4 + $0x1], 0  ;;  %s1143_s15 = smov 0   ;;  %s1145_s16 = smov 0  }
   0x8   :  { %s1147_s17 = smov 0   ;;  %s1149_s18 = smov 0  }
   0x9   :  { %s1151_s19 = smov 0   ;;  %s1153_s20 = smov 0  }
   0xa   :  { %s1155_s21 = smov 0   ;;  %s1157_s22 = smov 0  }
   0xb LB: > { %1375 = sst [smem:[#allocation12_spill]] %s1068_s15  ;;  %s749_s23 = sadd.s32 4294967295, %s1096_s22   ;;  %s1096_s22 = sphi %s1157_s22, %s22_s22   ;;  %s1092_s21 = sphi %s1155_s21, %s1395_s21   ;;  %s1088_s20 = sphi %s1153_s20, %s1394_s20   ;;  %s1084_s19 = sphi %s1151_s19, %s1393_s19   ;;  %s1080_s18 = sphi %s1149_s18, %s1392_s18   ;;  %s1076_s17 = sphi %s1147_s17, %s1391_s17   ;;  %s1072_s16 = sphi %s1145_s16, %s1390_s16   ;;  %s1068_s15 = sphi %s1143_s15, %s1389_s15  }
   0xc   : > { %p751_p0 = scmp.ge.s32.totalorder %s1096_s22, 1  ;;  %p1187_p1 = scmp.eq.s32.totalorder %s749_s23, 0 }
   0xd   : > { %p165_p2 = scmp.lt.s32.totalorder %s1096_s22, 5  ;;  %s1377_s1 = sld [smem:[#allocation15_spill]] }
   0xe   : > { %s1098_s29 = smov [#allocation5]   ;;  %s1379_s2 = sld [smem:[#allocation16_spill]] }
   0xf   : > { %p1195_p3 = pnand %p751_p0, %p165_p2  ;;  %s178_s30 = sshll.u32 %s1098_s29, 4  ;;  %s179_s30 = int_to_ptr.vmem [resolvable:$true] %s178_s30 }
  0x10   : > { %s1099_s8 = smov 64   ;;  %s1100_s9 = smov 4  }
  0x11   : > { %p799_p4 = pneg %p1195_p3  ;;  %s1101_s10 = smov [#allocation7]  }
  0x12   : > { %s193_s11 = sshll.u32 %s1101_s10, 4  ;;  %s750_s12 = sadd.s32 4294967294, %s1096_s22   ;;  %s194_s11 = int_to_ptr.vmem [resolvable:$true] %s193_s11 }
  0x13   : > { %s176_s27 = sshll.u32 %s1377_s1, 4  ;;  %p800_p5 = pnand %p799_p4, %p1187_p1  ;;  %s177_s27 = int_to_ptr.hbm [resolvable:$true] %s176_s27 }
  0x14   : > { %s191_s7 = sshll.u32 %s1379_s2, 4  ;;  %s31_s13 = sadd.s32 1, %s1088_s20  ;;  %s192_s7 = int_to_ptr.hbm [resolvable:$true] %s191_s7 }
  0x15   : > { %802 = dma.hbm_to_vmem [thread:$0]  (!%p800_p5), %s177_s27, 256, %s179_s30, [#allocation6], %s1099_s8, %s1099_s8, %s1100_s9  }
  0x16   : > { %805 = dma.hbm_to_vmem [thread:$0]  (!%p800_p5), %s192_s7, 32, %s194_s11, [#allocation6]  }
  0x17   : > { %p32_p6 = scmp.ge.s32.totalorder %s31_s13, 2  ;;  %s34_s14 = sadd.s32 1, %s1092_s21 }
  0x18   : > { %s43_s25 = sadd.s32 1, %s1076_s17  ;;  %p50_p7 = scmp.ne.s32.totalorder %s1076_s17, %s1072_s16 }
  0x19   : > { %s1397_s13 = smov (%p32_p6, %s31_s13), 0  ;;  %s1399_s14 = smov (!%p32_p6, %s34_s14), %s1092_s21 }
  0x1a   : > { %1380 = sst [smem:[#allocation13_spill]] %s1397_s13  ;;  %s39_s26 = ssub.s32 %s1088_s20, %s1397_s13 }
  0x1b   : > { %p51_p8 = scmp.eq.s32.totalorder %s1096_s22, 0  ;;  %p36_p9 = scmp.ge.s32.totalorder %s1399_s14, 2 }
  0x1c   : > { %p56_p10 = scmp.ne.s32.totalorder %s1072_s16, %s1068_s15  ;;  %p124_p12 = scmp.eq.s32.totalorder %s749_s23, 3 }
  0x1d   : > { %p1220_p11 = por %p51_p8, %p50_p7  ;;  %s1401_s14 = smov (%p36_p9, %s1399_s14), 0 }
  0x1e   : > { %1382 = sst [smem:[#allocation14_spill]] %s1401_s14  ;;  %p1230_p13 = por %p1187_p1, %p56_p10 }
  0x1f   : > { %p1234_p0 = por %p124_p12, %p50_p7  ;;  %s38_s5 = ssub.s32 %s1092_s21, %s1401_s14 }
  0x20   : > { %p130_p2 = scmp.eq.s32.totalorder %s750_s12, 3  ;;  %s40_s6 = sor.u32 %s39_s26, %s38_s5 }
  0x21   : > { %p816_p4 = scmp.lt.s32.totalorder %s1096_s22, 4  ;;  %p41_p5 = scmp.eq.s32.totalorder %s40_s6, 0 }
  0x22   : > { %p1241_p6 = por %p130_p2, %p56_p10  ;;  %s204_s7 = sand.u32 1, %s1076_s17  }
  0x23   : > { %s756_s8 = sshll.u32 %s1088_s20, 1  ;;  %s755_s10 = sshll.u32 %s204_s7, 2 }
  0x24   : > { %s1248_s9 = scalar_select %p41_p5, %s1076_s17, %s43_s25  }
  0x25   : > { %s757_s11 = sshll.u32 %s1092_s21, 2  ;;  %s208_s2 = scalar_lea.vmem [#allocation2], %s755_s10 }
  0x26   : > { %s213_s1 = sadd.s32 %s757_s11, %s756_s8  ;;  %s219_s13 = sshll.u32 %s208_s2, 4  ;;  %s220_s13 = int_to_ptr.vmem [resolvable:$true] %s219_s13 }
  0x27   : > { %s758_s14 = sshll.u32 %s213_s1, 1  ;;  %p807_p7 = pnand %p816_p4, %p1220_p11 }
  0x28   : > { %s215_s26 = scalar_lea.hbm %s1365_s0, %s758_s14  ;;  %s205_s6 = scalar_lea.sflag [#allocation3], %s204_s7 }
  0x29   : > { %s217_s5 = sshll.u32 %s215_s26, 4  ;;  %228 = sbr.rel (%p1195_p3) target bundleno = 744 (0x2e8), region = 32  ;;  %s218_s5 = int_to_ptr.hbm [resolvable:$true] %s217_s5 }
  0x2a   : > { %809 = dma.hbm_to_vmem [thread:$0]  (!%p807_p7), %s218_s5, 64, %s220_s13, %s205_s6  }
  0x2b   : > { %s1261_s25 = sand.u32 (!%p1195_p3), 1, %s1072_s16  }
  0x2c   : > { %s760_s1 = sshll.u32 (!%p1195_p3), %s1261_s25, 2  ;;  %s231_s2 = scalar_lea.sflag (!%p1195_p3), [#allocation3], %s1261_s25 }
  0x2d   : > { %s234_s15 = scalar_lea.vmem (!%p1195_p3), [#allocation2], %s760_s1 }
  0x2e   : > { %1055 = dma.done.wait (%p1230_p13), %s231_s2, 64  }
  0x2f   : > { %1057 = vsyncadd (%p1230_p13), %s231_s2, 4294967232 }
  0x30   : > { %1059 = dma.done.wait (%p1187_p1), [#allocation6], 288  }
  0x31   : > { %1061 = vsyncadd (%p1187_p1), [#allocation6], 4294967008  ;;  %v290_v0 = vld [vmem:[#allocation7] sm:$0x3]  ;;  %s1102_s28 = smov 2   ;;  %s1103_s13 = smov 18  }
  0x32   : > { %v292_v1 = vpack.i.b16 %v290_v0, %v290_v0  ;;  %s1104_s14 = smov 34   ;;  %s1105_s27 = smov 16   ;;  %v1277_v6 = vld [vmem:[%s234_s15] sm:$0xf]  ;;  %vm305_vm0 = vcmask 15360   ;;  %vm320_vm1 = vcmask 130048  }
  0x33   : > { %s1106_s29 = smov 32   ;;  %v1280_v7 = vunpack.c.l.bf16 %v1277_v6  ;;  %vm334_vm2 = vcmask 146432   ;;  %s1107_s24 = smov 126   ;;  %vm348_vm3 = vcmask 261120   ;;  %vm362_vm4 = vcmask 277504  }
  0x34   : > { %v299_v2 = vperm.slane %v292_v1, 1  ;;  %v294_v4 = vperm.slane %v292_v1, 0  ;;  %s1108_s7 = smov 110   ;;  %s1109_s8 = smov 96   ;;  %vm466_vm5 = vcmask 769024   ;;  %vm468_vm6 = vcmask 1041408  }
  0x35   : > { %s1110_s10 = smov 94   ;;  %s1111_s11 = smov 127   ;;  %vm419_vm7 = vcmask 908288   ;;  %vm432_vm8 = vcmask 900096   ;;  %vm443_vm9 = vcmask 785408   ;;  %vm455_vm10 = vcmask 777216  }
  0x36   : > { %v300_v3 = vunpack.c.l.bf16 %v299_v2  ;;  %v1273_v5 = vunpack.c.l.bf16 %v294_v4  ;;  %s1112_s12 = smov 111   ;;  %s1113_s26 = smov 95   ;;  %vm472_vm11 = vcmask 1043456   ;;  %vm475_vm12 = vcmask 1045504  }
  0x37   : > { %s1114_s5 = smov 112   ;;  %vm384_vm13 = vcmask 1039360   ;;  %vm395_vm14 = vcmask 1031168   ;;  %vm408_vm15 = vcmask 916480   ;;  %s763_s6 = sshll.u32 %s1261_s25, 5 }
  0x38   : > { %302 = vrot.lane.b32.xlu0 %v300_v3, %s1102_s28  ;;  %331 = vrot.lane.b32.xlu1 %v300_v3, %s1103_s13  ;;  %s267_s1 = scalar_lea.vmem [#allocation8], %s763_s6  ;;  %s778_s2 = sshll.u32 %s1084_s19, 3 }
  0x39   : > { %359 = vrot.lane.b32.xlu2 %v300_v3, %s1104_s14  ;;  %s594_s15 = sshll.u32 %s267_s1, 4  ;;  %s591_s28 = sadd.s32 %s1080_s18, %s778_s2  ;;  %s1312_s15 = int_to_ptr.vmem [resolvable:$true] %s594_s15 }
  0x3a   : > { %s779_s13 = sshll.u32 %s591_s28, 3 }
  0x40   : > { %317 = vrot.lane.b32.xlu0 %v1273_v5, %s1105_s27  ;;  %345 = vrot.lane.b32.xlu1 %v1273_v5, %s1106_s29  ;;  %s593_s29 = scalar_lea.hbm %s1368_s3, %s779_s13 }
  0x93   : > { %v360_v30 = vpop.permute.xlu2 %359 }
  0x94   : > { %v361_v32 = vrot.slane %v360_v30, 4 }
  0x96   : > { %v363_v38 = vsel %vm362_vm4, %v361_v32, %v360_v30 }
  0x97   : > { %v365_v41 = vmul.f32 %v363_v38, %v1280_v7 }
  0xaa   : > { %v303_v8 = vpop.permute.xlu0 %302  ;;  %v332_v12 = vpop.permute.xlu1 %331 }
  0xab   : > { %v304_v9 = vrot.slane %v303_v8, 4  ;;  %v333_v17 = vrot.slane %v332_v12, 4 }
  0xad   : > { %v306_v10 = vsel %vm305_vm0, %v304_v9, %v303_v8  ;;  %v335_v22 = vsel %vm334_vm2, %v333_v17, %v332_v12 }
  0xae   : > { %v308_v11 = vmul.f32 %v306_v10, %v1280_v7  ;;  %v337_v25 = vmul.f32 %v335_v22, %v1280_v7 }
  0xb0   : > { %310 = vst [vmem:[#allocation1] ss:$2 sm:$0xff] %v308_v11 }
  0xb2   : > { %v318_v13 = vpop.permute.xlu0 %317  ;;  %v346_v23 = vpop.permute.xlu1 %345 }
  0xb3   : > { %v319_v14 = vrot.slane %v318_v13, 4  ;;  %v347_v26 = vrot.slane %v346_v23, 4 }
  0xb5   : > { %v321_v15 = vsel %vm320_vm1, %v319_v14, %v318_v13  ;;  %v349_v29 = vsel %vm348_vm3, %v347_v26, %v346_v23  ;;  %vm501_vm1 = vcmask 293888  }
  0xb6   : > { %v323_v16 = vmul.f32 %v321_v15, %v1280_v7  ;;  %v351_v31 = vmul.f32 %v349_v29, %v1280_v7 }
  0xb7   : > { %v311_v18 = vld.sshfl [vmem:[#allocation1] sm:$0xff pattern:$0x75316420]  ;;  %v312_v19 = vld.sshfl [vmem:[#allocation1 + $0x8] sm:$0xff pattern:$0x75316420] }
  0xb8   : > { %325 = vst [vmem:[#allocation1] ss:$2 sm:$0xff] %v323_v16  ;;  %v1285_v20 = vpack.c.bf16 %v312_v19, %v311_v18 }
  0xba   : > { %v387_v21 = vunpack.c.l.b16 %v1285_v20  ;;  %v388_v62 = vunpack.c.h.b16 %v1285_v20 }
  0xbc   : > { %v389_v24 = vpack.c.b16 %v387_v21, %v387_v21  ;;  %v390_v0 = vpack.c.b16 %v388_v62, %v388_v62 }
  0xbe   : > { %391 = vrot.lane.b32.xlu2 %v389_v24, %s1107_s24 }
  0xbf   : > { %v326_v27 = vld.sshfl [vmem:[#allocation1] sm:$0xff pattern:$0x75316420]  ;;  %v327_v28 = vld.sshfl [vmem:[#allocation1 + $0x8] sm:$0xff pattern:$0x75316420] }
  0xc0   : > { %339 = vst [vmem:[#allocation1] ss:$2 sm:$0xff] %v337_v25  ;;  %v330_v63 = vpack.c.bf16 %v327_v28, %v326_v27  ;;  %v297_v28 = vmul.f32 %v1273_v5, %v1280_v7 }
  0xc2   : > { %v398_v1 = vunpack.c.l.b16 %v330_v63  ;;  %v399_v4 = vunpack.c.h.b16 %v330_v63 }
  0xc4   : > { %v400_v8 = vpack.c.b16 %v398_v1, %v398_v1  ;;  %v401_v9 = vpack.c.b16 %v399_v4, %v399_v4 }
  0xc6   : > { %v402_v10 = vrot.slane %v400_v8, 2  ;;  %v403_v11 = vrot.slane %v401_v9, 2 }
  0xc7   : > { %v340_v33 = vld.sshfl [vmem:[#allocation1] sm:$0xff pattern:$0x75316420]  ;;  %v341_v34 = vld.sshfl [vmem:[#allocation1 + $0x8] sm:$0xff pattern:$0x75316420] }
  0xc8   : > { %v344_v35 = vpack.c.bf16 %v341_v34, %v340_v33  ;;  %353 = vst [vmem:[#allocation1] ss:$2 sm:$0xff] %v351_v31 }
  0xca   : > { %v423_v36 = vunpack.c.h.b16 %v344_v35  ;;  %v422_v37 = vunpack.c.l.b16 %v344_v35  ;;  %v298_v35 = vpack.c.bf16 %v297_v28, %v297_v28 }
  0xcc   : > { %v425_v39 = vpack.c.b16 %v423_v36, %v423_v36  ;;  %v424_v40 = vpack.c.b16 %v422_v37, %v422_v37 }
  0xce   : > { %v427_v42 = vrot.slane %v425_v39, 6  ;;  %v426_v43 = vrot.slane %v424_v40, 6 }
  0xcf   : > { %v354_v44 = vld.sshfl [vmem:[#allocation1] sm:$0xff pattern:$0x75316420]  ;;  %v355_v45 = vld.sshfl [vmem:[#allocation1 + $0x8] sm:$0xff pattern:$0x75316420] }
  0xd0   : > { %430 = vrot.lane.b32.xlu1 %v427_v42, %s1108_s7  ;;  %428 = vrot.lane.b32.xlu0 %v426_v43, %s1108_s7  ;;  %v358_v46 = vpack.c.bf16 %v355_v45, %v354_v44  ;;  %367 = vst [vmem:[#allocation1] ss:$2 sm:$0xff] %v365_v41  ;;  %v782_v42 = vld [vmem:[#allocation5] sm:$0xff]  ;;  %v783_v43 = vld [vmem:[#allocation5 + $0x8] sm:$0xff]  ;;  %s572_s7 = scalar_lea.sflag [#allocation4], %s1261_s25 }
  0xd2   : > { %v435_v47 = vunpack.c.l.b16 %v358_v46  ;;  %v436_v48 = vunpack.c.h.b16 %v358_v46 }
  0xd4   : > { %v437_v49 = vpack.c.b16 %v435_v47, %v435_v47  ;;  %v438_v50 = vpack.c.b16 %v436_v48, %v436_v48 }
  0xd6   : > { %439 = vrot.lane.b32.xlu2 %v437_v49, %s1109_s8 }
  0xd7   : > { %v368_v51 = vld.sshfl [vmem:[#allocation1] sm:$0xff pattern:$0x75316420]  ;;  %v369_v52 = vld.sshfl [vmem:[#allocation1 + $0x8] sm:$0xff pattern:$0x75316420] }
  0xd8   : > { %441 = vrot.lane.b32.xlu0 %v438_v50, %s1109_s8  ;;  %v372_v53 = vpack.c.bf16 %v369_v52, %v368_v51  ;;  %375 = vst [vmem:[#allocation1 + $0x1] ss:$4 sm:$0xff] %v1277_v6 }
  0xda   : > { %v458_v54 = vunpack.c.l.b16 %v372_v53  ;;  %v459_v55 = vunpack.c.h.b16 %v372_v53 }
  0xdc   : > { %v460_v56 = vpack.c.b16 %v458_v54, %v458_v54  ;;  %v461_v57 = vpack.c.b16 %v459_v55, %v459_v55 }
  0xde   : > { %462 = vrot.lane.b32.xlu2 %v460_v56, %s1110_s10 }
  0xdf   : > { %v376_v58 = vld.sshfl [vmem:[#allocation1] sm:$0xff pattern:$0x73625140]  ;;  %v378_v59 = vld.sshfl [vmem:[#allocation1 + $0x8] sm:$0xff pattern:$0x73625140] }
  0xe0   : > { %382 = vrot.lane.b32.xlu1 %v378_v59, %s1111_s11  ;;  %410 = vst [vmem:[#allocation1] ss:$4 sm:$0xff] %v1277_v6  ;;  %464 = vrot.lane.b32.xlu0 %v461_v57, %s1110_s10 }
  0xe7   : > { %v411_v60 = vld.sshfl [vmem:[#allocation1] sm:$0xff pattern:$0x73625140]  ;;  %v413_v61 = vld.sshfl [vmem:[#allocation1 + $0x8] sm:$0xff pattern:$0x73625140] }
  0xe8   : > { %415 = vrot.lane.b32.xlu1 %v411_v60, %s1112_s12  ;;  %380 = vrot.lane.b32.xlu0 %v376_v58, %s1111_s11  ;;  %446 = vst [vmem:[#allocation1 + $0x3] ss:$4 sm:$0xff] %v1277_v6 }
  0xe9   : > { %417 = vrot.lane.b32.xlu2 %v413_v61, %s1112_s12 }
  0xef   : > { %v447_v2 = vld.sshfl [vmem:[#allocation1] sm:$0xff pattern:$0x73625140]  ;;  %v449_v3 = vld.sshfl [vmem:[#allocation1 + $0x8] sm:$0xff pattern:$0x73625140] }
  0xf0   : > { %451 = vrot.lane.b32.xlu1 %v447_v2, %s1113_s26  ;;  %393 = vrot.lane.b32.xlu0 %v390_v0, %s1107_s24  ;;  %s596_s24 = sshll.u32 %s593_s29, 4  ;;  %s597_s24 = int_to_ptr.hbm [resolvable:$true] %s596_s24 }
  0xf1   : > { %453 = vrot.lane.b32.xlu2 %v449_v3, %s1113_s26  ;;  %s1008_s8 = sshra.s32 %s597_s24, 4  ;;  %s1014_s26 = scalar_lea.hbm %s1368_s3, 128  ;;  %s1009_s8 = int_to_ptr.hbm [resolvable:$true] %s1008_s8 }
  0xf2   : > { %s1010_s10 = scalar_lea.hbm %s1009_s8, 32  ;;  %p1015_p9 = scmp.lt.s32.totalorder %s1009_s8, %s1368_s3 }
  0xf3   : > { %p1011_p1 = scmp.ne.s32.totalorder %s1009_s8, %s1010_s10  ;;  %p1016_p10 = scmp.lt.s32.totalorder %s1014_s26, %s1010_s10 }
  0xf5   : > { %p1012_p3 = pnand %p1011_p1, %p1234_p0  ;;  %p1017_p11 = por %p1016_p10, %p1015_p9 }
  0xf7   : > { %p1013_p8 = pneg %p1012_p3 }
  0xf8   : > { %404 = vrot.lane.b32.xlu1 %v402_v10, %s1114_s5 }
  0xf9   : > { %406 = vrot.lane.b32.xlu2 %v403_v11, %s1114_s5  ;;  %p1018_p12 = pnand %p1017_p11, %p1013_p8 }
 0x118   : > { %v392_v6 = vpop.permute.xlu2 %391 }
 0x130   : > { %v440_v13 = vpop.permute.xlu2 %439 }
 0x138   : > { %v463_v16 = vpop.permute.xlu2 %462 }
 0x142   : > { %v429_v12 = vpop.permute.xlu0 %428  ;;  %v431_v14 = vpop.permute.xlu1 %430 }
 0x143   : > { %v418_v21 = vpop.permute.xlu2 %417  ;;  %v433_v25 = vsel %vm432_vm8, %v429_v12, %v431_v14 }
 0x14a   : > { %v442_v15 = vpop.permute.xlu0 %441 }
 0x14b   : > { %v454_v26 = vpop.permute.xlu2 %453  ;;  %v444_v29 = vsel %vm443_vm9, %v440_v13, %v442_v15 }
 0x152   : > { %v383_v17 = vpop.permute.xlu1 %382  ;;  %v465_v18 = vpop.permute.xlu0 %464 }
 0x153   : > { %v467_v19 = vsel %vm466_vm5, %v463_v16, %v465_v18  ;;  %v407_v38 = vpop.permute.xlu2 %406 }
 0x154   : > { %v509_v20 = vsel %vm468_vm6, %v467_v19, 0 }
 0x155   : > { %516 = vmatpush.bf16.msra.mxu0 %v509_v20  ;;  %784 = vmatpush.bf16.msra.mxu1 %v509_v20 }
 0x15a   : > { %v416_v22 = vpop.permute.xlu1 %415  ;;  %v381_v23 = vpop.permute.xlu0 %380 }
 0x15b   : > { %v420_v24 = vsel %vm419_vm7, %v416_v22, %v418_v21  ;;  %v385_v36 = vsel %vm384_vm13, %v381_v23, %v383_v17 }
 0x15c   : > { %v481_v27 = vsel %vm468_vm6, %v420_v24, %v433_v25  ;;  %v471_v5 = vsel %vm468_vm6, %v298_v35, %v385_v36 }
 0x15d   : > { %v483_v32 = vsel %vm472_vm11, %v481_v27, %v444_v29 }
 0x162   : > { %v452_v30 = vpop.permute.xlu1 %451  ;;  %v394_v34 = vpop.permute.xlu0 %393 }
 0x163   : > { %v456_v31 = vsel %vm455_vm10, %v452_v30, %v454_v26  ;;  %v396_v37 = vsel %vm395_vm14, %v392_v6, %v394_v34 }
 0x164   : > { %v485_v33 = vsel %vm475_vm12, %v483_v32, %v456_v31  ;;  %v474_v40 = vsel %vm472_vm11, %v471_v5, %v396_v37 }
 0x165   : > { %517 = vmatpush.bf16.msra.mxu0 %v485_v33  ;;  %785 = vmatpush.bf16.msra.mxu1 %v485_v33 }
 0x16a   : > { %v405_v7 = vpop.permute.xlu1 %404 }
 0x16b   : > { %v409_v39 = vsel %vm408_vm15, %v405_v7, %v407_v38 }
 0x16c   : > { %v477_v41 = vsel %vm475_vm12, %v474_v40, %v409_v39 }
 0x16d   : > { %518 = vmatpush.bf16.msra.mxu0 %v477_v41  ;;  %786 = vmatpush.bf16.msra.mxu1 %v477_v41 }
 0x170   : > { %775 = vmatmul.msk.bf16.vlgmr.msra.gmra.mxu0 %vm501_vm1, %v782_v42  ;;  %776 = vmatmul.msk.bf16.vlgmr.msra.gmra.mxu1 %vm501_vm1, %v783_v43 }
 0x1ed   : > { %v520_v44 = vpop.f32.mrf.mxu0  ;;  %v525_v45 = vpop.f32.mrf.mxu1 }
 0x1ee   : > { %567 = vst [vmem:[%s267_s1] sm:$0xff] %v520_v44  ;;  %534 = vadd.xlane.f32.xlu2 %v525_v45  ;;  %530 = vadd.xlane.f32.xlu0 %v520_v44 }
 0x1ef   : > { %569 = vst [vmem:[%s267_s1 + $0x10] sm:$0xff] %v525_v45 }
 0x1f5   : > { %v522_v46 = vpop.f32.mrf.mxu0  ;;  %v527_v47 = vpop.f32.mrf.mxu1 }
 0x1f6   : > { %568 = vst [vmem:[%s267_s1 + $0x8] sm:$0xff] %v522_v46  ;;  %536 = vadd.xlane.f32.xlu2 %v527_v47  ;;  %532 = vadd.xlane.f32.xlu1 %v522_v46 }
 0x1f7   : > { %570 = vst [vmem:[%s267_s1 + $0x18] sm:$0xff] %v527_v47 }
 0x261   : > { %v535_v48 = vpop.xlane.xlu2 %534  ;;  %v531_v49 = vpop.xlane.xlu0 %530 }
 0x262   : > { %v540_v50 = vmul.f32 0.0078125, %v535_v48  ;;  %v538_v51 = vmul.f32 0.0078125, %v531_v49 }
 0x264   : > { %v544_v52 = vsub.f32 %v525_v45, %v540_v50  ;;  %v542_v53 = vsub.f32 %v520_v44, %v538_v51 }
 0x266   : > { %v548_v54 = vmul.f32 %v544_v52, %v544_v52  ;;  %v546_v55 = vmul.f32 %v542_v53, %v542_v53 }
 0x268   : > { %554 = vadd.xlane.f32.xlu2 %v548_v54  ;;  %550 = vadd.xlane.f32.xlu0 %v546_v55 }
 0x269   : > { %1021 = shalt.err (!%p1018_p12)
}
 0x26a   : > { %s1115_s25 = smov 128   ;;  %s1116_s1 = smov 256   ;;  %v537_v56 = vpop.xlane.xlu2 %536  ;;  %v533_v57 = vpop.xlane.xlu1 %532  ;;  %vm558_vm2 = vcmask 7168  }
 0x26b   : > { %s1117_s2 = smov 8   ;;  %v541_v58 = vmul.f32 0.0078125, %v537_v56  ;;  %v539_v59 = vmul.f32 0.0078125, %v533_v57  ;;  %p279_p13 = scmp.lt.s32.totalorder %s1084_s19, 1 }
 0x26c   : > { %797 = dma.vmem_to_hbm [thread:$0]  (%p1234_p0), %s1312_s15, 512, %s597_s24, %s572_s7, %s1115_s25, %s1116_s1, %s1117_s2  }
 0x26d   : > { %v545_v60 = vsub.f32 %v527_v47, %v541_v58  ;;  %v543_v61 = vsub.f32 %v522_v46, %v539_v59  ;;  %p281_p2 = scmp.lt.s32.totalorder %s1080_s18, 1  ;;  %s1403_s19 = smov (!%p279_p13, %s1084_s19), 1 }
 0x26e   : > { %s765_s13 = sshll.u32 %s1403_s19, 3 }
 0x26f   : > { %v549_v62 = vmul.f32 %v545_v60, %v545_v60  ;;  %v547_v63 = vmul.f32 %v543_v61, %v543_v61  ;;  %s1405_s18 = smov (!%p281_p2, %s1080_s18), 1 }
 0x270   : > { %s764_s28 = sshll.u32 %s1405_s18, 2 }
 0x271   : > { %556 = vadd.xlane.f32.xlu0 %v549_v62  ;;  %552 = vadd.xlane.f32.xlu1 %v547_v63  ;;  %s285_s14 = sadd.s32 %s765_s13, %s764_s28 }
 0x272   : > { %s766_s27 = sshll.u32 %s285_s14, 3 }
 0x273   : > { %s287_s29 = scalar_lea.vmem %s1369_s4, %s766_s27 }
 0x2db   : > { %v555_v0 = vpop.xlane.xlu2 %554  ;;  %v551_v1 = vpop.xlane.xlu0 %550 }
 0x2dc   : > { %v561_v2 = vsel %vm558_vm2, %v540_v50, %v555_v0  ;;  %v559_v3 = vsel %vm558_vm2, %v538_v51, %v551_v1 }
 0x2dd   : > { %565 = vst.msk [vmem:[%s287_s29 + $0x10] sm:$0xff] %vm305_vm0, %v561_v2 }
 0x2de   : > { %563 = vst.msk [vmem:[%s287_s29] sm:$0xff] %vm305_vm0, %v559_v3 }
 0x2e4   : > { %v557_v4 = vpop.xlane.xlu0 %556  ;;  %v553_v8 = vpop.xlane.xlu1 %552 }
 0x2e5   : > { %v562_v9 = vsel %vm558_vm2, %v541_v58, %v557_v4  ;;  %v560_v10 = vsel %vm558_vm2, %v539_v59, %v553_v8 }
 0x2e6   : > { %566 = vst.msk [vmem:[%s287_s29 + $0x18] sm:$0xff] %vm305_vm0, %v562_v9 }
 0x2e7   : > { %564 = vst.msk [vmem:[%s287_s29 + $0x8] sm:$0xff] %vm305_vm0, %v560_v10 }
 0x2e8 PF: > { %s1386_s18 = sld [smem:[#allocation12_spill]]  ;;  %p819_p0 = scmp.ge.s32.totalorder %s1096_s22, 2 }
 0x2ea   : > { %p811_p4 = pnand %p819_p0, %p1241_p6 }
 0x2ec   : > { %p812_p5 = pneg %p811_p4 }
 0x2ee   : > { %s614_s19 = sand.u32 1, %s1386_s18  }
 0x2ef   : > { %s615_s24 = scalar_lea.sflag [#allocation4], %s614_s19 }
 0x2f0   : > { %1063 = dma.done.wait (%p812_p5), %s615_s24, 512  }
 0x2f1   : > { %1065 = vsyncadd (%p812_p5), %s615_s24, 4294966784  ;;  %s22_s22 = sadd.s32 1, %s1096_s22   ;;  %s1387_s7 = sld [smem:[#allocation13_spill]] }
 0x2f2   : > { %p19_p7 = scmp.ge.s32.totalorder %s22_s22, 6   ;;  %s1388_s8 = sld [smem:[#allocation14_spill]] }
 0x2f3   : > { %s1389_s15 = smov %s1072_s16  ;;  %s1390_s16 = smov %s1076_s17 }
 0x2f4   : > { %s1391_s17 = smov %s1248_s9  ;;  %s1392_s18 = smov %s1088_s20 }
 0x2f5   : > { %s1393_s19 = smov %s1092_s21  ;;  %21 = sbr.rel (!%p19_p7) target bundleno = 11 (0xb), region = 99 }
 0x2f7   : > { %s1394_s20 = smov %s1387_s7 }
 0x2f8   : > { %s1395_s21 = smov %s1388_s8 }
 0x2fa   :  { %633 = vsyncpa [#allocation3], 1 }
 0x2fb   :  { %635 = vsyncpa [#allocation3 + $0x1], 1 }
 0x2fc   :  { %636 = vsyncpa [#allocation6], 1 }
 0x2fd   :  { %637 = vsyncpa [#allocation4], 1 }
 0x2fe   :  { %639 = vsyncpa [#allocation4 + $0x1], 1 }

</bundles_post_ra>
